<compile_context>
chip_gen: v7x
topology: tpu7x:2x2x1
jax: 0.10.0
libtpu: 0.0.40
codegen_flags: <defaults>
</compile_context>

<pallas_src>
import jax
import jax.numpy as jnp
from jax.experimental import pallas as pl
from jax.experimental.pallas import tpu as pltpu


def _round_up(x, m):
    return (x + m - 1) // m * m


def _fused_affine_sigmoid_kernel(text_ref, img_ref, w2_ref, wl_ref, b_ref, out_ref):
    """One batch tile: out = sigmoid(text @ W2_eff + img @ Wl_eff + b_eff)."""
    acc = jnp.dot(text_ref[...], w2_ref[...], preferred_element_type=jnp.float32)
    acc = acc + jnp.dot(img_ref[...], wl_ref[...], preferred_element_type=jnp.float32)
    acc = acc + b_ref[...]                                  # (1, Cp) f32 bias, broadcast
    out_ref[...] = jax.nn.sigmoid(acc).astype(out_ref.dtype)


def combine_model_forward(text_tens, img_backbone_feat, params, *, hidden_size,
                          batch_tile=256, compute_dtype=jnp.bfloat16):
    """JAX wrapper: fold fc2/last_layer into fc3, pad to TPU-friendly shapes, run a batch-tiled
    pallas_call with VMEM-resident folded weights."""
    B = text_tens.shape[0]
    H = hidden_size
    D = img_backbone_feat.shape[1]                          # 1000 (torchvision classifier logits)

    w2, b2 = params["w2"], params["b2"]                     # (K, H), (1, H)
    wl, bl = params["wl"], params["bl"]                     # (D, 2H), (1, 2H)
    w3, b3 = params["w3"], params["b3"]                     # (3H, C), (1, C)
    K = w2.shape[0]
    C = w3.shape[1]

    # ---- Fold the two linear stages into fc3 (exact: no nonlinearity between them), in f32. ----
    w3_text = w3[:H, :]                                     # (H, C)
    w3_img = w3[H:, :]                                      # (2H, C)
    w2_eff = w2 @ w3_text                                   # (K, C)
    wl_eff = wl @ w3_img                                    # (D, C)
    b_eff = b2 @ w3_text + bl @ w3_img + b3                 # (1, C)

    # ---- Lane/sublane-dense padding and batch tiling. ----
    Kp = _round_up(K, 128)
    Dp = _round_up(D, 128)                                  # 1000 -> 1024
    Cp = _round_up(C, 128)                                  # lane-dense output (no masked stores)
    TB = min(batch_tile, _round_up(B, 8))                   # batch tile (multiple of 8 sublanes)
    Bp = _round_up(B, TB)

    text_flat = text_tens.reshape(B, -1).astype(compute_dtype)
    text_flat = jnp.pad(text_flat, ((0, Bp - B), (0, Kp - K)))
    img_feat = jnp.pad(img_backbone_feat.astype(compute_dtype), ((0, Bp - B), (0, Dp - D)))
    w2_eff = jnp.pad(w2_eff, ((0, Kp - K), (0, Cp - C))).astype(compute_dtype)
    wl_eff = jnp.pad(wl_eff, ((0, Dp - D), (0, Cp - C))).astype(compute_dtype)
    b_eff = jnp.pad(b_eff, ((0, 0), (0, Cp - C))).astype(jnp.float32)

    grid = (Bp // TB,)

    # VMEM budget: double-buffered batch tiles (text/img/out) + resident folded weights + headroom.
    itemsize = jnp.dtype(compute_dtype).itemsize
    bytes_needed = (2 * TB * Kp * itemsize        # text tiles (double-buffered)
                    + 2 * TB * Dp * itemsize      # img tiles
                    + 2 * TB * Cp * 4             # f32 output tiles
                    + Kp * Cp * itemsize          # resident W2_eff
                    + Dp * Cp * itemsize          # resident Wl_eff
                    + Cp * 4)                     # resident bias
    vmem_limit = max(32 << 20, min(48 << 20, int(bytes_needed * 1.5) + (4 << 20)))

    out = pl.pallas_call(
        _fused_affine_sigmoid_kernel,
        out_shape=jax.ShapeDtypeStruct((Bp, Cp), jnp.float32),
        grid_spec=pltpu.PrefetchScalarGridSpec(
            num_scalar_prefetch=0,
            grid=grid,
            in_specs=[
                pl.BlockSpec((TB, Kp), lambda i: (i, 0)),   # text tile   (pipelined over batch)
                pl.BlockSpec((TB, Dp), lambda i: (i, 0)),   # img tile    (pipelined over batch)
                pl.BlockSpec((Kp, Cp), lambda i: (0, 0)),   # folded text weights (VMEM-resident)
                pl.BlockSpec((Dp, Cp), lambda i: (0, 0)),   # folded img weights  (VMEM-resident)
                pl.BlockSpec((1, Cp), lambda i: (0, 0)),    # folded bias          (VMEM-resident)
            ],
            out_specs=pl.BlockSpec((TB, Cp), lambda i: (i, 0)),
        ),
        compiler_params=pltpu.CompilerParams(
            dimension_semantics=("parallel",),              # v7x: shard batch tiles across 2 TCs
            vmem_limit_bytes=vmem_limit,
        ),
    )(text_flat, img_feat, w2_eff, wl_eff, b_eff)

    return out[:B, :C]


def init_params(key, *, len_vocab, n_length, hidden_size, n_classes):
    """Deterministic PyTorch-style (uniform +-1/sqrt(fan_in)) init, weights stored as (in, out)."""
    def linear(k, fan_in, fan_out):
        kw, kb = jax.random.split(k)
        bound = 1.0 / jnp.sqrt(fan_in)
        w = jax.random.uniform(kw, (fan_in, fan_out), jnp.float32, -bound, bound)
        b = jax.random.uniform(kb, (1, fan_out), jnp.float32, -bound, bound)
        return w, b

    k2, kl, k3 = jax.random.split(key, 3)
    w2, b2 = linear(k2, n_length * len_vocab, hidden_size)      # fc2
    wl, bl = linear(kl, 1000, hidden_size * 2)                  # last_layer
    w3, b3 = linear(k3, hidden_size * 3, n_classes)             # fc3
    return {"w2": w2, "b2": b2, "wl": wl, "bl": bl, "w3": w3, "b3": b3}


def reference_forward(text_tens, img_backbone_feat, params):
    """Pure-JAX f32 reference of the ORIGINAL (unfolded) module math."""
    B = text_tens.shape[0]
    text_feat = text_tens.reshape(B, -1) @ params["w2"] + params["b2"]
    img_feat = img_backbone_feat @ params["wl"] + params["bl"]
    logits = jnp.concatenate([text_feat, img_feat], axis=1) @ params["w3"] + params["b3"]
    return jax.nn.sigmoid(logits)


def reference_forward_folded(text_tens, img_backbone_feat, params, *, hidden_size,
                             compute_dtype=jnp.bfloat16):
    """Pure-JAX reference of the SAME folded / bf16 pipeline the kernel runs (tight check)."""
    B = text_tens.shape[0]
    H = hidden_size
    w3_text = params["w3"][:H, :]
    w3_img = params["w3"][H:, :]
    w2_eff = (params["w2"] @ w3_text).astype(compute_dtype)
    wl_eff = (params["wl"] @ w3_img).astype(compute_dtype)
    b_eff = params["b2"] @ w3_text + params["bl"] @ w3_img + params["b3"]
    logits = (jnp.dot(text_tens.reshape(B, -1).astype(compute_dtype), w2_eff,
                      preferred_element_type=jnp.float32)
              + jnp.dot(img_backbone_feat.astype(compute_dtype), wl_eff,
                        preferred_element_type=jnp.float32)
              + b_eff)
    return jax.nn.sigmoid(logits)


if __name__ == "__main__":
    # Small shapes consistent with the module's forward.
    B = 2
    n_length = 4
    len_vocab = 256        # module default is 3072; shrunk for a quick synthetic run
    hidden_size = 64
    n_classes = 8
    backbone_dim = 1000    # fixed by torchvision classifiers (resnet101 -> 1000 logits)

    key = jax.random.PRNGKey(0)
    k_params, k_text, k_img = jax.random.split(key, 3)

    params = init_params(k_params, len_vocab=len_vocab, n_length=n_length,
                         hidden_size=hidden_size, n_classes=n_classes)

    text_tens = jax.random.normal(k_text, (B, n_length, len_vocab), jnp.float32)
    img_backbone_feat = jax.random.normal(k_img, (B, backbone_dim), jnp.float32)

    out = combine_model_forward(text_tens, img_backbone_feat, params,
                                hidden_size=hidden_size)
    out = jax.block_until_ready(out)
    assert out.shape == (B, n_classes)

    # Tight check vs. a pure-JAX reference running the identical folded bf16 math.
    ref_matched = reference_forward_folded(text_tens, img_backbone_feat, params,
                                           hidden_size=hidden_size)
    assert jnp.allclose(out, ref_matched, atol=1e-4, rtol=1e-4)

    # Loose check vs. the original unfolded all-f32 forward (bf16 weight rounding only).
    ref_exact = reference_forward(text_tens, img_backbone_feat, params)
    assert jnp.allclose(out, ref_exact, atol=3e-2, rtol=3e-2)

    print("KERNEL_OK")
</pallas_src>

<mosaic_0001>
module attributes {stable_mosaic.version = 11 : i64} {
  func.func @_fused_affine_sigmoid_kernel(%arg0: i32, %arg1: memref<8x1024xbf16, #tpu.memory_space<vmem>>, %arg2: memref<8x1024xbf16, #tpu.memory_space<vmem>>, %arg3: memref<1024x128xbf16, #tpu.memory_space<vmem>>, %arg4: memref<1024x128xbf16, #tpu.memory_space<vmem>>, %arg5: memref<1x128xf32, #tpu.memory_space<vmem>>, %arg6: memref<8x128xf32, #tpu.memory_space<vmem>>) attributes {dimension_semantics = [#tpu.dimension_semantics<parallel>], iteration_bounds = array<i64: 1>, scalar_prefetch = 0 : i64, scratch_operands = 0 : i64, tpu.core_type = #tpu.core_type<tc>, window_params = [{transform_indices = @transform_0, window_bounds = array<i64: 8, 1024>}, {transform_indices = @transform_1, window_bounds = array<i64: 8, 1024>}, {pipeline_mode = #tpu.pipeline_mode<synchronous>, transform_indices = @transform_2, window_bounds = array<i64: 1024, 128>}, {pipeline_mode = #tpu.pipeline_mode<synchronous>, transform_indices = @transform_3, window_bounds = array<i64: 1024, 128>}, {pipeline_mode = #tpu.pipeline_mode<synchronous>, transform_indices = @transform_4, window_bounds = array<i64: 1, 128>}, {transform_indices = @transform_5, window_bounds = array<i64: 8, 128>}]} {
    %c0 = arith.constant 0 : index
    %c0_0 = arith.constant 0 : index
    %0 = vector.load %arg1[%c0, %c0_0] : memref<8x1024xbf16, #tpu.memory_space<vmem>>, vector<8x1024xbf16>
    %c0_1 = arith.constant 0 : index
    %c0_2 = arith.constant 0 : index
    %1 = vector.load %arg3[%c0_1, %c0_2] : memref<1024x128xbf16, #tpu.memory_space<vmem>>, vector<1024x128xbf16>
    %cst = arith.constant dense<0.000000e+00> : vector<8x128xf32>
    %2 = tpu.matmul %0, %1, %cst {dimension_numbers = #tpu.dot_dimension_numbers<[1], [0], [0], [1], [0, 0, 1, 1], [], []>} : vector<8x1024xbf16>, vector<1024x128xbf16>, vector<8x128xf32> -> vector<8x128xf32>
    %c0_3 = arith.constant 0 : index
    %c0_4 = arith.constant 0 : index
    %3 = vector.load %arg2[%c0_3, %c0_4] : memref<8x1024xbf16, #tpu.memory_space<vmem>>, vector<8x1024xbf16>
    %c0_5 = arith.constant 0 : index
    %c0_6 = arith.constant 0 : index
    %4 = vector.load %arg4[%c0_5, %c0_6] : memref<1024x128xbf16, #tpu.memory_space<vmem>>, vector<1024x128xbf16>
    %cst_7 = arith.constant dense<0.000000e+00> : vector<8x128xf32>
    %5 = tpu.matmul %3, %4, %cst_7 {dimension_numbers = #tpu.dot_dimension_numbers<[1], [0], [0], [1], [0, 0, 1, 1], [], []>} : vector<8x1024xbf16>, vector<1024x128xbf16>, vector<8x128xf32> -> vector<8x128xf32>
    %6 = arith.addf %2, %5 : vector<8x128xf32>
    %c0_8 = arith.constant 0 : index
    %c0_9 = arith.constant 0 : index
    %7 = vector.load %arg5[%c0_8, %c0_9] : memref<1x128xf32, #tpu.memory_space<vmem>>, vector<1x128xf32>
    %8 = vector.broadcast %7 : vector<1x128xf32> to vector<8x128xf32>
    %9 = arith.addf %6, %8 : vector<8x128xf32>
    %10 = arith.negf %9 : vector<8x128xf32>
    %11 = math.exp %10 : vector<8x128xf32>
    %cst_10 = arith.constant 1.000000e+00 : f32
    %12 = vector.broadcast %cst_10 : f32 to vector<8x128xf32>
    %13 = arith.addf %12, %11 : vector<8x128xf32>
    %14 = arith.divf %12, %13 : vector<8x128xf32>
    %c0_11 = arith.constant 0 : index
    %c0_12 = arith.constant 0 : index
    %15 = vector.load %arg6[%c0_11, %c0_12] : memref<8x128xf32, #tpu.memory_space<vmem>>, vector<8x128xf32>
    tpu.vector_store %arg6[%c0_11, %c0_12], %14 {strides = array<i32>} : memref<8x128xf32, #tpu.memory_space<vmem>>, vector<8x128xf32>,
    return
  }
  func.func @transform_0(%arg0: i32) -> (i32, i32) {
    %c0_i32 = arith.constant 0 : i32
    %c0_i32_0 = arith.constant 0 : i32
    return %arg0, %c0_i32 : i32, i32
  }
  func.func @transform_1(%arg0: i32) -> (i32, i32) {
    %c0_i32 = arith.constant 0 : i32
    %c0_i32_0 = arith.constant 0 : i32
    return %arg0, %c0_i32 : i32, i32
  }
  func.func @transform_2(%arg0: i32) -> (i32, i32) {
    %c0_i32 = arith.constant 0 : i32
    %c0_i32_0 = arith.constant 0 : i32
    %c0_i32_1 = arith.constant 0 : i32
    return %c0_i32, %c0_i32_0 : i32, i32
  }
  func.func @transform_3(%arg0: i32) -> (i32, i32) {
    %c0_i32 = arith.constant 0 : i32
    %c0_i32_0 = arith.constant 0 : i32
    %c0_i32_1 = arith.constant 0 : i32
    return %c0_i32, %c0_i32_0 : i32, i32
  }
  func.func @transform_4(%arg0: i32) -> (i32, i32) {
    %c0_i32 = arith.constant 0 : i32
    %c0_i32_0 = arith.constant 0 : i32
    %c0_i32_1 = arith.constant 0 : i32
    return %c0_i32, %c0_i32_0 : i32, i32
  }
  func.func @transform_5(%arg0: i32) -> (i32, i32) {
    %c0_i32 = arith.constant 0 : i32
    %c0_i32_0 = arith.constant 0 : i32
    return %arg0, %c0_i32 : i32, i32
  }
}

</mosaic_0001>

<bundles_post_ra>
// kernel: tpu_custom_call.1
= control target key start
LH: loop header
LB: loop body
LE: loop exit
PB: predicated region body
PF: predicated region fallthrough
CT: control target
= control target key end

     0   :  { %10 = vsyncpa [#allocation3], 0  ;;  %s2208_s0 = inlined_call_operand.hbm [shape: bf16[8,1024], index: 0, kind: input, shape index: {}]   ;;  %s2209_s1 = inlined_call_operand.hbm [shape: bf16[8,1024], index: 1, kind: input, shape index: {}]   ;;  %s2210_s2 = inlined_call_operand.hbm [shape: bf16[1024,128], index: 2, kind: input, shape index: {}]   ;;  %s2211_s3 = inlined_call_operand.hbm [shape: bf16[1024,128], index: 3, kind: input, shape index: {}]   ;;  %s2212_s4 = inlined_call_operand.vmem [shape: f32[1,128], index: 4, kind: input, shape index: {}]   ;;  %s2213_s5 = inlined_call_operand.hbm [shape: f32[8,128], index: 5, kind: output, shape index: {}]  }
   0x1   :  { %11 = vsyncpa [#allocation6], 0 }
   0x2   :  { %12 = vsyncpa [#allocation9], 0 }
   0x3   :  { %13 = vsyncpa [#allocation4], 0  ;;  %s2108_s18 = smov [#allocation5]   ;;  %s2109_s20 = smov [#allocation2]  }
   0x4   :  { %s30_s19 = sshll.u32 %s2108_s18, 4  ;;  %s20_s21 = sshll.u32 %s2109_s20, 4  ;;  %s31_s19 = int_to_ptr.vmem [resolvable:$true] %s30_s19  ;;  %s21_s21 = int_to_ptr.vmem [resolvable:$true] %s20_s21 }
   0x5   :  { %s1990_s24 = scalar_lea.hbm %s2209_s1, 512 }
   0x6   :  { %p1991_p0 = scmp.ne.s32.totalorder %s2209_s1, %s1990_s24  ;;  %p1994_p1 = scmp.lt.u32.totalorder %s1990_s24, %s2209_s1 }
   0x8   :  { %p1996_p2 = pnand %p1994_p1, %p1991_p0 }
   0xa   :  { %1999 = shalt.err (!%p1996_p2)
}
   0xb   :  { %s2000_s29 = scalar_lea.vmem %s31_s19, 512  ;;  %p2005_p4 = scmp.lt.s32.totalorder %s31_s19, %s31_s19 }
   0xc   :  { %p2001_p3 = scmp.ne.s32.totalorder %s31_s19, %s2000_s29  ;;  %p2006_p5 = scmp.lt.s32.totalorder %s2000_s29, %s2000_s29 }
   0xe   :  { %p2007_p6 = por %p2006_p5, %p2005_p4 }
  0x10   :  { %p2008_p7 = pnand %p2007_p6, %p2001_p3 }
  0x12   :  { %2011 = shalt.err (!%p2008_p7)
}
  0x13   :  { %33 = dma.hbm_to_vmem [thread:$0]  %s2209_s1, 512, %s31_s19, [#allocation6]  }
  0x14   :  { %s2012_s9 = scalar_lea.hbm %s2208_s0, 512 }
  0x15   :  { %p2013_p8 = scmp.ne.s32.totalorder %s2208_s0, %s2012_s9  ;;  %p2016_p9 = scmp.lt.u32.totalorder %s2012_s9, %s2208_s0 }
  0x17   :  { %p2018_p10 = pnand %p2016_p9, %p2013_p8 }
  0x19   :  { %2021 = shalt.err (!%p2018_p10)
}
  0x1a   :  { %s2022_s14 = scalar_lea.vmem %s21_s21, 512  ;;  %p2027_p12 = scmp.lt.s32.totalorder %s21_s21, %s21_s21 }
  0x1b   :  { %p2023_p11 = scmp.ne.s32.totalorder %s21_s21, %s2022_s14  ;;  %p2028_p13 = scmp.lt.s32.totalorder %s2022_s14, %s2022_s14 }
  0x1d   :  { %p2029_p0 = por %p2028_p13, %p2027_p12 }
  0x1f   :  { %p2030_p1 = pnand %p2029_p0, %p2023_p11 }
  0x21   :  { %2033 = shalt.err (!%p2030_p1)
}
  0x22   :  { %23 = dma.hbm_to_vmem [thread:$0]  %s2208_s0, 512, %s21_s21, [#allocation3]  }
  0x23   :  { %s2110_s16 = smov [#allocation7]   ;;  %s2034_s20 = scalar_lea.hbm %s2210_s2, 8192 }
  0x24   :  { %s39_s17 = sshll.u32 %s2110_s16, 4  ;;  %p2035_p2 = scmp.ne.s32.totalorder %s2210_s2, %s2034_s20  ;;  %s40_s17 = int_to_ptr.vmem [resolvable:$true] %s39_s17 }
  0x25   :  { %p2038_p3 = scmp.lt.u32.totalorder %s2034_s20, %s2210_s2 }
  0x27   :  { %p2040_p4 = pnand %p2038_p3, %p2035_p2 }
  0x29   :  { %2043 = shalt.err (!%p2040_p4)
}
  0x2a   :  { %s2044_s26 = scalar_lea.vmem %s40_s17, 8192  ;;  %p2049_p6 = scmp.lt.s32.totalorder %s40_s17, %s40_s17 }
  0x2b   :  { %p2045_p5 = scmp.ne.s32.totalorder %s40_s17, %s2044_s26  ;;  %p2050_p7 = scmp.lt.s32.totalorder %s2044_s26, %s2044_s26 }
  0x2d   :  { %p2051_p8 = por %p2050_p7, %p2049_p6 }
  0x2f   :  { %p2052_p9 = pnand %p2051_p8, %p2045_p5 }
  0x31   :  { %2055 = shalt.err (!%p2052_p9)
}
  0x32   :  { %s2111_s0 = smov 64   ;;  %s2112_s21 = smov 4  }
  0x33   :  { %45 = dma.hbm_to_vmem [thread:$0]  %s2210_s2, 8192, %s40_s17, [#allocation6], %s2111_s0, %s2111_s0, %s2112_s21  }
  0x34   :  { %s2113_s29 = smov [#allocation8]   ;;  %s2056_s8 = scalar_lea.hbm %s2211_s3, 8192 }
  0x35   :  { %s51_s30 = sshll.u32 %s2113_s29, 4  ;;  %p2057_p10 = scmp.ne.s32.totalorder %s2211_s3, %s2056_s8  ;;  %s52_s30 = int_to_ptr.vmem [resolvable:$true] %s51_s30 }
  0x36   :  { %p2060_p11 = scmp.lt.u32.totalorder %s2056_s8, %s2211_s3 }
  0x38   :  { %p2062_p12 = pnand %p2060_p11, %p2057_p10 }
  0x3a   :  { %2065 = shalt.err (!%p2062_p12)
}
  0x3b   :  { %s2066_s13 = scalar_lea.vmem %s52_s30, 8192  ;;  %p2071_p0 = scmp.lt.s32.totalorder %s52_s30, %s52_s30 }
  0x3c   :  { %p2067_p13 = scmp.ne.s32.totalorder %s52_s30, %s2066_s13  ;;  %p2072_p1 = scmp.lt.s32.totalorder %s2066_s13, %s2066_s13 }
  0x3e   :  { %p2073_p2 = por %p2072_p1, %p2071_p0 }
  0x40   :  { %p2074_p3 = pnand %p2073_p2, %p2067_p13 }
  0x42   :  { %2077 = shalt.err (!%p2074_p3)
}
  0x43   :  { %57 = dma.hbm_to_vmem [thread:$0]  %s2211_s3, 8192, %s52_s30, [#allocation9], %s2111_s0, %s2111_s0, %s2112_s21  }
  0x44   :  { %2100 = dma.done.wait [#allocation3], 512  }
  0x45   :  { %2101 = vsyncadd [#allocation3], 4294966784 }
  0x46   :  { %2102 = dma.done.wait [#allocation6], 8704  }
  0x47   :  { %2103 = vsyncadd [#allocation6], 4294958592 }
  0x48   :  { %2104 = dma.done.wait [#allocation9], 8192  }
  0x49   :  { %2105 = vsyncadd [#allocation9], 4294959104  ;;  %v1842_v0 = vld [vmem:[#allocation8 + $0x40] sm:$0xff]   ;;  %v1846_v4 = vld [vmem:[#allocation8 + $0x48] sm:$0xff]   ;;  %s2114_s15 = smov [#allocation10]  }
  0x4a   :  { %v1843_v1 = vld [vmem:[#allocation8 + $0xc0] sm:$0xff]   ;;  %1659 = vmatprep.subr.bf16.mxu0 %v1842_v0  ;;  %v1847_v5 = vld [vmem:[#allocation8 + $0xc8] sm:$0xff]   ;;  %v1850_v8 = vld [vmem:[#allocation8 + $0x50] sm:$0xff]   ;;  %s1502_s16 = sshll.u32 %s2114_s15, 4  ;;  %s1503_s16 = int_to_ptr.vmem [resolvable:$true] %s1502_s16 }
  0x4b   :  { %v1844_v2 = vld [vmem:[#allocation8] sm:$0xff]   ;;  %1681 = vmatprep.subr.bf16.mxu1 %v1843_v1  ;;  %v1848_v6 = vld [vmem:[#allocation8 + $0x8] sm:$0xff]   ;;  %v1851_v9 = vld [vmem:[#allocation8 + $0xd0] sm:$0xff]   ;;  %s2078_s17 = scalar_lea.vmem %s1503_s16, 128  ;;  %p2083_p5 = scmp.lt.s32.totalorder %s1503_s16, %s1503_s16 }
  0x4c   :  { %v1845_v3 = vld [vmem:[#allocation8 + $0x80] sm:$0xff]   ;;  %1660 = vmatpush3.bf16.msra.mxu0 %v1844_v2  ;;  %v1849_v7 = vld [vmem:[#allocation8 + $0x88] sm:$0xff]   ;;  %v1852_v10 = vld [vmem:[#allocation8 + $0x10] sm:$0xff]   ;;  %p2079_p4 = scmp.ne.s32.totalorder %s1503_s16, %s2078_s17  ;;  %p2084_p6 = scmp.lt.s32.totalorder %s2078_s17, %s2078_s17 }
  0x4d   :  { %1682 = vmatpush3.bf16.msra.mxu1 %v1845_v3  ;;  %1661 = vmatprep.subr.bf16.mxu0 %v1846_v4  ;;  %v1853_v11 = vld [vmem:[#allocation8 + $0x90] sm:$0xff]   ;;  %v1854_v12 = vld [vmem:[#allocation8 + $0x58] sm:$0xff]   ;;  %v1858_v16 = vld [vmem:[#allocation8 + $0x60] sm:$0xff]  }
  0x4e   :  { %1683 = vmatprep.subr.bf16.mxu1 %v1847_v5  ;;  %v1855_v13 = vld [vmem:[#allocation8 + $0xd8] sm:$0xff]   ;;  %v1859_v17 = vld [vmem:[#allocation8 + $0xe0] sm:$0xff]   ;;  %v1862_v20 = vld [vmem:[#allocation8 + $0x68] sm:$0xff]   ;;  %p2085_p7 = por %p2084_p6, %p2083_p5 }
  0x4f   :  { %v1856_v14 = vld [vmem:[#allocation8 + $0x18] sm:$0xff]   ;;  %v1860_v18 = vld [vmem:[#allocation8 + $0x20] sm:$0xff]   ;;  %v1863_v21 = vld [vmem:[#allocation8 + $0xe8] sm:$0xff]  }
  0x50   :  { %1662 = vmatpush3.bf16.msra.mxu0 %v1848_v6  ;;  %v1857_v15 = vld [vmem:[#allocation8 + $0x98] sm:$0xff]   ;;  %v1861_v19 = vld [vmem:[#allocation8 + $0xa0] sm:$0xff]   ;;  %v1864_v22 = vld [vmem:[#allocation8 + $0x28] sm:$0xff]   ;;  %p2086_p8 = pnand %p2085_p7, %p2079_p4 }
  0x51   :  { %1684 = vmatpush3.bf16.msra.mxu1 %v1849_v7  ;;  %1663 = vmatprep.subr.bf16.mxu0 %v1850_v8  ;;  %v1865_v23 = vld [vmem:[#allocation8 + $0xa8] sm:$0xff]   ;;  %v1866_v24 = vld [vmem:[#allocation8 + $0x70] sm:$0xff]   ;;  %v1870_v28 = vld [vmem:[#allocation8 + $0x78] sm:$0xff]  }
  0x52   :  { %1685 = vmatprep.subr.bf16.mxu1 %v1851_v9  ;;  %v1867_v25 = vld [vmem:[#allocation8 + $0xf0] sm:$0xff]   ;;  %v1871_v29 = vld [vmem:[#allocation8 + $0xf8] sm:$0xff]   ;;  %v205_v32 = vld [vmem:[#allocation5] sm:$0xff] }
  0x53   :  { %v1868_v26 = vld [vmem:[#allocation8 + $0x30] sm:$0xff]   ;;  %v1872_v30 = vld [vmem:[#allocation8 + $0x38] sm:$0xff]   ;;  %v206_v33 = vld [vmem:[#allocation5 + $0x8] sm:$0xff]  ;;  %v1513_v34 = vcombine.low %v205_v32, %v205_v32  ;;  %v1514_v35 = vcombine.high %v205_v32, %v205_v32 }
  0x54   :  { %1664 = vmatpush3.bf16.msra.mxu0 %v1852_v10  ;;  %v1869_v27 = vld [vmem:[#allocation8 + $0xb0] sm:$0xff]   ;;  %v1873_v31 = vld [vmem:[#allocation8 + $0xb8] sm:$0xff]   ;;  %v1515_v36 = vcombine.low %v206_v33, %v206_v33  ;;  %v1516_v37 = vcombine.high %v206_v33, %v206_v33  ;;  %v1878_v38 = vld [vmem:[#allocation8 + $0x140] sm:$0xff]  }
  0x55   :  { %1686 = vmatpush3.bf16.msra.mxu1 %v1853_v11  ;;  %1665 = vmatprep.subr.bf16.mxu0 %v1854_v12  ;;  %v1879_v39 = vld [vmem:[#allocation8 + $0x1c0] sm:$0xff]   ;;  %v1882_v42 = vld [vmem:[#allocation8 + $0x148] sm:$0xff]   ;;  %v1886_v46 = vld [vmem:[#allocation8 + $0x150] sm:$0xff]  }
  0x56   :  { %1687 = vmatprep.subr.bf16.mxu1 %v1855_v13  ;;  %781 = vmatprep.mubr.bf16.mxu0 %v1514_v35  ;;  %v1880_v40 = vld [vmem:[#allocation8 + $0x100] sm:$0xff]   ;;  %v1883_v43 = vld [vmem:[#allocation8 + $0x1c8] sm:$0xff]   ;;  %v1887_v47 = vld [vmem:[#allocation8 + $0x1d0] sm:$0xff]  }
  0x57   :  { %821 = vmatprep.mubr.bf16.mxu1 %v1516_v37  ;;  %v1881_v41 = vld [vmem:[#allocation8 + $0x180] sm:$0xff]   ;;  %v1884_v44 = vld [vmem:[#allocation8 + $0x108] sm:$0xff]   ;;  %v1888_v48 = vld [vmem:[#allocation8 + $0x110] sm:$0xff]  }
  0x58   :  { %1666 = vmatpush3.bf16.msra.mxu0 %v1856_v14  ;;  %v1885_v45 = vld [vmem:[#allocation8 + $0x188] sm:$0xff]   ;;  %v1889_v49 = vld [vmem:[#allocation8 + $0x190] sm:$0xff]   ;;  %v1890_v50 = vld [vmem:[#allocation8 + $0x158] sm:$0xff]  }
  0x59   :  { %1688 = vmatpush3.bf16.msra.mxu1 %v1857_v15  ;;  %1667 = vmatprep.subr.bf16.mxu0 %v1858_v16  ;;  %v1891_v51 = vld [vmem:[#allocation8 + $0x1d8] sm:$0xff]   ;;  %v1894_v54 = vld [vmem:[#allocation8 + $0x160] sm:$0xff]   ;;  %v1898_v58 = vld [vmem:[#allocation8 + $0x168] sm:$0xff]  }
  0x5a   :  { %1689 = vmatprep.subr.bf16.mxu1 %v1859_v17  ;;  %v1892_v52 = vld [vmem:[#allocation8 + $0x118] sm:$0xff]   ;;  %v1895_v55 = vld [vmem:[#allocation8 + $0x1e0] sm:$0xff]   ;;  %v1899_v59 = vld [vmem:[#allocation8 + $0x1e8] sm:$0xff]  }
  0x5b   :  { %v1893_v53 = vld [vmem:[#allocation8 + $0x198] sm:$0xff]   ;;  %v1896_v56 = vld [vmem:[#allocation8 + $0x120] sm:$0xff]   ;;  %v1900_v60 = vld [vmem:[#allocation8 + $0x128] sm:$0xff]  }
  0x5c   :  { %1668 = vmatpush3.bf16.msra.mxu0 %v1860_v18  ;;  %v1897_v57 = vld [vmem:[#allocation8 + $0x1a0] sm:$0xff]   ;;  %v1901_v61 = vld [vmem:[#allocation8 + $0x1a8] sm:$0xff]   ;;  %v1902_v62 = vld [vmem:[#allocation8 + $0x170] sm:$0xff]  }
  0x5d   :  { %1690 = vmatpush3.bf16.msra.mxu1 %v1861_v19  ;;  %1669 = vmatprep.subr.bf16.mxu0 %v1862_v20  ;;  %v1903_v63 = vld [vmem:[#allocation8 + $0x1f0] sm:$0xff]   ;;  %v1906_v2 = vld [vmem:[#allocation8 + $0x178] sm:$0xff]   ;;  %v1914_v12 = vld [vmem:[#allocation7 + $0x40] sm:$0xff]  }
  0x5e   :  { %1691 = vmatprep.subr.bf16.mxu1 %v1863_v21  ;;  %v1904_v0 = vld [vmem:[#allocation8 + $0x130] sm:$0xff]   ;;  %v1907_v3 = vld [vmem:[#allocation8 + $0x1f8] sm:$0xff]   ;;  %v1915_v13 = vld [vmem:[#allocation7 + $0xc0] sm:$0xff]  }
  0x5f   :  { %v1905_v1 = vld [vmem:[#allocation8 + $0x1b0] sm:$0xff]   ;;  %v1908_v4 = vld [vmem:[#allocation8 + $0x138] sm:$0xff]   ;;  %v1916_v14 = vld [vmem:[#allocation7] sm:$0xff]  }
  0x60   :  { %1670 = vmatpush3.bf16.msra.mxu0 %v1864_v22  ;;  %v1909_v5 = vld [vmem:[#allocation8 + $0x1b8] sm:$0xff]   ;;  %v207_v6 = vld [vmem:[#allocation5 + $0x10] sm:$0xff]  ;;  %v1917_v15 = vld [vmem:[#allocation7 + $0x80] sm:$0xff]  }
  0x61   :  { %1692 = vmatpush3.bf16.msra.mxu1 %v1865_v23  ;;  %1671 = vmatprep.subr.bf16.mxu0 %v1866_v24  ;;  %v1517_v7 = vcombine.low %v207_v6, %v207_v6  ;;  %v1518_v8 = vcombine.high %v207_v6, %v207_v6  ;;  %v208_v9 = vld [vmem:[#allocation5 + $0x18] sm:$0xff]  ;;  %v1918_v16 = vld [vmem:[#allocation7 + $0x48] sm:$0xff]   ;;  %v1922_v20 = vld [vmem:[#allocation7 + $0x50] sm:$0xff]  }
  0x62   :  { %1693 = vmatprep.subr.bf16.mxu1 %v1867_v25  ;;  %v1519_v10 = vcombine.low %v208_v9, %v208_v9  ;;  %v1520_v11 = vcombine.high %v208_v9, %v208_v9  ;;  %v1919_v17 = vld [vmem:[#allocation7 + $0xc8] sm:$0xff]   ;;  %v1923_v21 = vld [vmem:[#allocation7 + $0xd0] sm:$0xff]   ;;  %v1926_v24 = vld [vmem:[#allocation7 + $0x58] sm:$0xff]  }
  0x63   :  { %v1920_v18 = vld [vmem:[#allocation7 + $0x8] sm:$0xff]   ;;  %v1924_v22 = vld [vmem:[#allocation7 + $0x10] sm:$0xff]   ;;  %v1927_v25 = vld [vmem:[#allocation7 + $0xd8] sm:$0xff]  }
  0x64   :  { %1672 = vmatpush3.bf16.msra.mxu0 %v1868_v26  ;;  %v1921_v19 = vld [vmem:[#allocation7 + $0x88] sm:$0xff]   ;;  %v1925_v23 = vld [vmem:[#allocation7 + $0x90] sm:$0xff]   ;;  %v1928_v26 = vld [vmem:[#allocation7 + $0x18] sm:$0xff]  }
  0x65   :  { %1694 = vmatpush3.bf16.msra.mxu1 %v1869_v27  ;;  %1673 = vmatprep.subr.bf16.mxu0 %v1870_v28  ;;  %v1929_v27 = vld [vmem:[#allocation7 + $0x98] sm:$0xff]   ;;  %v1930_v28 = vld [vmem:[#allocation7 + $0x60] sm:$0xff]   ;;  %v1934_v32 = vld [vmem:[#allocation7 + $0x68] sm:$0xff]  }
  0x66   :  { %1695 = vmatprep.subr.bf16.mxu1 %v1871_v29  ;;  %v1931_v29 = vld [vmem:[#allocation7 + $0xe0] sm:$0xff]   ;;  %v1935_v33 = vld [vmem:[#allocation7 + $0xe8] sm:$0xff]   ;;  %v1939_v37 = vld [vmem:[#allocation7 + $0xf0] sm:$0xff]  }
  0x67   :  { %v1937_v35 = vld [vmem:[#allocation7 + $0xa8] sm:$0xff]  }
  0x68   :  { %1674 = vmatpush3.bf16.msra.mxu0 %v1872_v30  ;;  %v1932_v30 = vld [vmem:[#allocation7 + $0x20] sm:$0xff]   ;;  %v1970_v6 = vld [vmem:[#allocation7 + $0x168] sm:$0xff]  }
  0x69   :  { %1696 = vmatpush3.bf16.msra.mxu1 %v1873_v31  ;;  %1703 = vmatprep.subr.bf16.mxu0 %v1878_v38  ;;  %v1933_v31 = vld [vmem:[#allocation7 + $0xa0] sm:$0xff]   ;;  %v1940_v38 = vld [vmem:[#allocation7 + $0x30] sm:$0xff]   ;;  %v1973_v9 = vld [vmem:[#allocation7 + $0x1a8] sm:$0xff]  }
  0x6a   :  { %1725 = vmatprep.subr.bf16.mxu1 %v1879_v39  ;;  %v1941_v39 = vld [vmem:[#allocation7 + $0xb0] sm:$0xff]  }
  0x6b   :  { %782 = vmatmul.mubr.bf16.vlgmr.msra.gmra.mrb[0].mxu0 %v1513_v34  ;;  %v1936_v34 = vld [vmem:[#allocation7 + $0x28] sm:$0xff]  }
  0x6c   :  { %822 = vmatmul.mubr.bf16.vlgmr.msra.gmra.mrb[0].mxu1 %v1515_v36  ;;  %1704 = vmatpush3.bf16.msra.mxu0 %v1880_v40  ;;  %v1938_v36 = vld [vmem:[#allocation7 + $0x70] sm:$0xff]   ;;  %v1942_v40 = vld [vmem:[#allocation7 + $0x78] sm:$0xff]  }
  0x6d   :  { %1726 = vmatpush3.bf16.msra.mxu1 %v1881_v41  ;;  %1705 = vmatprep.subr.bf16.mxu0 %v1882_v42  ;;  %v1943_v41 = vld [vmem:[#allocation7 + $0xf8] sm:$0xff]  }
  0x6e   :  { %1727 = vmatprep.subr.bf16.mxu1 %v1883_v43  ;;  %861 = vmatprep.mubr.bf16.mxu0 %v1518_v8  ;;  %v1944_v42 = vld [vmem:[#allocation7 + $0x38] sm:$0xff]   ;;  %v1972_v8 = vld [vmem:[#allocation7 + $0x128] sm:$0xff]  }
  0x6f   :  { %901 = vmatprep.mubr.bf16.mxu1 %v1520_v11  ;;  %v1945_v43 = vld [vmem:[#allocation7 + $0xb8] sm:$0xff]   ;;  %v1975_v11 = vld [vmem:[#allocation7 + $0x1f0] sm:$0xff]  }
  0x70   :  { %1706 = vmatpush3.bf16.msra.mxu0 %v1884_v44  ;;  %v73_v44 = vld [vmem:[#allocation2] sm:$0xff] }
  0x71   :  { %1728 = vmatpush3.bf16.msra.mxu1 %v1885_v45  ;;  %1707 = vmatprep.subr.bf16.mxu0 %v1886_v46  ;;  %v74_v45 = vld [vmem:[#allocation2 + $0x8] sm:$0xff]  ;;  %v1585_v46 = vcombine.low %v73_v44, %v73_v44 }
  0x72   :  { %1729 = vmatprep.subr.bf16.mxu1 %v1887_v47  ;;  %v1586_v47 = vcombine.high %v73_v44, %v73_v44 }
  0x74   :  { %1708 = vmatpush3.bf16.msra.mxu0 %v1888_v48  ;;  %v1587_v48 = vcombine.low %v74_v45, %v74_v45 }
  0x75   :  { %1730 = vmatpush3.bf16.msra.mxu1 %v1889_v49  ;;  %1709 = vmatprep.subr.bf16.mxu0 %v1890_v50  ;;  %v1588_v49 = vcombine.high %v74_v45, %v74_v45  ;;  %v1950_v50 = vld [vmem:[#allocation7 + $0x140] sm:$0xff]  }
  0x76   :  { %1731 = vmatprep.subr.bf16.mxu1 %v1891_v51  ;;  %v1951_v51 = vld [vmem:[#allocation7 + $0x1c0] sm:$0xff]  }
  0x78   :  { %1710 = vmatpush3.bf16.msra.mxu0 %v1892_v52  ;;  %v1952_v52 = vld [vmem:[#allocation7 + $0x100] sm:$0xff]  }
  0x79   :  { %1732 = vmatpush3.bf16.msra.mxu1 %v1893_v53  ;;  %1711 = vmatprep.subr.bf16.mxu0 %v1894_v54  ;;  %v1953_v53 = vld [vmem:[#allocation7 + $0x180] sm:$0xff]   ;;  %v1954_v54 = vld [vmem:[#allocation7 + $0x148] sm:$0xff]  }
  0x7a   :  { %1733 = vmatprep.subr.bf16.mxu1 %v1895_v55  ;;  %v1955_v55 = vld [vmem:[#allocation7 + $0x1c8] sm:$0xff]  }
  0x7c   :  { %1712 = vmatpush3.bf16.msra.mxu0 %v1896_v56  ;;  %v1956_v56 = vld [vmem:[#allocation7 + $0x108] sm:$0xff]  }
  0x7d   :  { %1734 = vmatpush3.bf16.msra.mxu1 %v1897_v57  ;;  %1713 = vmatprep.subr.bf16.mxu0 %v1898_v58  ;;  %v1957_v57 = vld [vmem:[#allocation7 + $0x188] sm:$0xff]   ;;  %v1958_v58 = vld [vmem:[#allocation7 + $0x150] sm:$0xff]  }
  0x7e   :  { %1735 = vmatprep.subr.bf16.mxu1 %v1899_v59  ;;  %v1959_v59 = vld [vmem:[#allocation7 + $0x1d0] sm:$0xff]  }
  0x80   :  { %1714 = vmatpush3.bf16.msra.mxu0 %v1900_v60  ;;  %v1960_v60 = vld [vmem:[#allocation7 + $0x110] sm:$0xff]  }
  0x81   :  { %1736 = vmatpush3.bf16.msra.mxu1 %v1901_v61  ;;  %1715 = vmatprep.subr.bf16.mxu0 %v1902_v62  ;;  %v1961_v61 = vld [vmem:[#allocation7 + $0x190] sm:$0xff]   ;;  %v1962_v62 = vld [vmem:[#allocation7 + $0x158] sm:$0xff]  }
  0x82   :  { %1737 = vmatprep.subr.bf16.mxu1 %v1903_v63  ;;  %v1963_v63 = vld [vmem:[#allocation7 + $0x1d8] sm:$0xff]  }
  0x84   :  { %1716 = vmatpush3.bf16.msra.mxu0 %v1904_v0  ;;  %v1964_v0 = vld [vmem:[#allocation7 + $0x118] sm:$0xff]  }
  0x85   :  { %1738 = vmatpush3.bf16.msra.mxu1 %v1905_v1  ;;  %1717 = vmatprep.subr.bf16.mxu0 %v1906_v2  ;;  %v1965_v1 = vld [vmem:[#allocation7 + $0x198] sm:$0xff]   ;;  %v1966_v2 = vld [vmem:[#allocation7 + $0x160] sm:$0xff]  }
  0x86   :  { %1739 = vmatprep.subr.bf16.mxu1 %v1907_v3  ;;  %v1967_v3 = vld [vmem:[#allocation7 + $0x1e0] sm:$0xff]  }
  0x88   :  { %1718 = vmatpush3.bf16.msra.mxu0 %v1908_v4  ;;  %v1968_v4 = vld [vmem:[#allocation7 + $0x120] sm:$0xff]  }
  0x89   :  { %1740 = vmatpush3.bf16.msra.mxu1 %v1909_v5  ;;  %1747 = vmatprep.subr.bf16.mxu0 %v1914_v12  ;;  %v1969_v5 = vld [vmem:[#allocation7 + $0x1a0] sm:$0xff]   ;;  %v1976_v12 = vld [vmem:[#allocation7 + $0x130] sm:$0xff]  }
  0x8a   :  { %1769 = vmatprep.subr.bf16.mxu1 %v1915_v13  ;;  %v1977_v13 = vld [vmem:[#allocation7 + $0x1b0] sm:$0xff]  }
  0x8b   :  { %862 = vmatmul.mubr.bf16.vlgmr.msra.gmra.mrb[4].mxu0 %v1517_v7  ;;  %v1971_v7 = vld [vmem:[#allocation7 + $0x1e8] sm:$0xff]  }
  0x8c   :  { %902 = vmatmul.mubr.bf16.vlgmr.msra.gmra.mrb[4].mxu1 %v1519_v10  ;;  %1748 = vmatpush3.bf16.msra.mxu0 %v1916_v14  ;;  %v1974_v10 = vld [vmem:[#allocation7 + $0x170] sm:$0xff]   ;;  %v1978_v14 = vld [vmem:[#allocation7 + $0x178] sm:$0xff]  }
  0x8d   :  { %1770 = vmatpush3.bf16.msra.mxu1 %v1917_v15  ;;  %1749 = vmatprep.subr.bf16.mxu0 %v1918_v16  ;;  %v1979_v15 = vld [vmem:[#allocation7 + $0x1f8] sm:$0xff]  }
  0x8e   :  { %1771 = vmatprep.subr.bf16.mxu1 %v1919_v17  ;;  %1353 = vmatprep.mubr.bf16.mxu0 %v1586_v47  ;;  %v1980_v16 = vld [vmem:[#allocation7 + $0x138] sm:$0xff]  }
  0x8f   :  { %1393 = vmatprep.mubr.bf16.mxu1 %v1588_v49  ;;  %v1981_v17 = vld [vmem:[#allocation7 + $0x1b8] sm:$0xff]  }
  0x90   :  { %1750 = vmatpush3.bf16.msra.mxu0 %v1920_v18  ;;  %v75_v18 = vld [vmem:[#allocation2 + $0x10] sm:$0xff] }
  0x91   :  { %1772 = vmatpush3.bf16.msra.mxu1 %v1921_v19  ;;  %1751 = vmatprep.subr.bf16.mxu0 %v1922_v20  ;;  %v76_v19 = vld [vmem:[#allocation2 + $0x18] sm:$0xff]  ;;  %v1589_v20 = vcombine.low %v75_v18, %v75_v18 }
  0x92   :  { %1773 = vmatprep.subr.bf16.mxu1 %v1923_v21  ;;  %v1590_v21 = vcombine.high %v75_v18, %v75_v18 }
  0x94   :  { %1752 = vmatpush3.bf16.msra.mxu0 %v1924_v22  ;;  %v1591_v22 = vcombine.low %v76_v19, %v76_v19 }
  0x95   :  { %1774 = vmatpush3.bf16.msra.mxu1 %v1925_v23  ;;  %1753 = vmatprep.subr.bf16.mxu0 %v1926_v24  ;;  %v1592_v23 = vcombine.high %v76_v19, %v76_v19 }
  0x96   :  { %1775 = vmatprep.subr.bf16.mxu1 %v1927_v25 }
  0x98   :  { %1754 = vmatpush3.bf16.msra.mxu0 %v1928_v26 }
  0x99   :  { %1776 = vmatpush3.bf16.msra.mxu1 %v1929_v27  ;;  %1755 = vmatprep.subr.bf16.mxu0 %v1930_v28 }
  0x9a   :  { %1777 = vmatprep.subr.bf16.mxu1 %v1931_v29 }
  0x9c   :  { %1756 = vmatpush3.bf16.msra.mxu0 %v1932_v30 }
  0x9d   :  { %1778 = vmatpush3.bf16.msra.mxu1 %v1933_v31  ;;  %1757 = vmatprep.subr.bf16.mxu0 %v1934_v32 }
  0x9e   :  { %1779 = vmatprep.subr.bf16.mxu1 %v1935_v33 }
  0xa0   :  { %1758 = vmatpush3.bf16.msra.mxu0 %v1936_v34 }
  0xa1   :  { %1780 = vmatpush3.bf16.msra.mxu1 %v1937_v35  ;;  %1759 = vmatprep.subr.bf16.mxu0 %v1938_v36 }
  0xa2   :  { %1781 = vmatprep.subr.bf16.mxu1 %v1939_v37 }
  0xa4   :  { %1760 = vmatpush3.bf16.msra.mxu0 %v1940_v38 }
  0xa5   :  { %1782 = vmatpush3.bf16.msra.mxu1 %v1941_v39  ;;  %1761 = vmatprep.subr.bf16.mxu0 %v1942_v40 }
  0xa6   :  { %1783 = vmatprep.subr.bf16.mxu1 %v1943_v41 }
  0xa8   :  { %1762 = vmatpush3.bf16.msra.mxu0 %v1944_v42 }
  0xa9   :  { %1784 = vmatpush3.bf16.msra.mxu1 %v1945_v43  ;;  %1791 = vmatprep.subr.bf16.mxu0 %v1950_v50 }
  0xaa   :  { %1813 = vmatprep.subr.bf16.mxu1 %v1951_v51 }
  0xab   :  { %1354 = vmatmul.mubr.bf16.vlgmr.msra.gmra.mrb[8].mxu0 %v1585_v46 }
  0xac   :  { %1394 = vmatmul.mubr.bf16.vlgmr.msra.gmra.mrb[8].mxu1 %v1587_v48  ;;  %1792 = vmatpush3.bf16.msra.mxu0 %v1952_v52 }
  0xad   :  { %1814 = vmatpush3.bf16.msra.mxu1 %v1953_v53  ;;  %1793 = vmatprep.subr.bf16.mxu0 %v1954_v54 }
  0xae   :  { %1815 = vmatprep.subr.bf16.mxu1 %v1955_v55  ;;  %1433 = vmatprep.mubr.bf16.mxu0 %v1590_v21 }
  0xaf   :  { %1473 = vmatprep.mubr.bf16.mxu1 %v1592_v23 }
  0xb0   :  { %1794 = vmatpush3.bf16.msra.mxu0 %v1956_v56 }
  0xb1   :  { %1816 = vmatpush3.bf16.msra.mxu1 %v1957_v57  ;;  %1795 = vmatprep.subr.bf16.mxu0 %v1958_v58 }
  0xb2   :  { %1817 = vmatprep.subr.bf16.mxu1 %v1959_v59 }
  0xb4   :  { %1796 = vmatpush3.bf16.msra.mxu0 %v1960_v60 }
  0xb5   :  { %1818 = vmatpush3.bf16.msra.mxu1 %v1961_v61  ;;  %1797 = vmatprep.subr.bf16.mxu0 %v1962_v62 }
  0xb6   :  { %1819 = vmatprep.subr.bf16.mxu1 %v1963_v63 }
  0xb8   :  { %1798 = vmatpush3.bf16.msra.mxu0 %v1964_v0 }
  0xb9   :  { %1820 = vmatpush3.bf16.msra.mxu1 %v1965_v1  ;;  %1799 = vmatprep.subr.bf16.mxu0 %v1966_v2 }
  0xba   :  { %1821 = vmatprep.subr.bf16.mxu1 %v1967_v3 }
  0xbc   :  { %1800 = vmatpush3.bf16.msra.mxu0 %v1968_v4 }
  0xbd   :  { %1822 = vmatpush3.bf16.msra.mxu1 %v1969_v5  ;;  %1801 = vmatprep.subr.bf16.mxu0 %v1970_v6  ;;  %v1657_v6 = vld [vmem:[%s2212_s4] ss:$0 sm:$0xff] }
  0xbe   :  { %1823 = vmatprep.subr.bf16.mxu1 %v1971_v7 }
  0xc0   :  { %1802 = vmatpush3.bf16.msra.mxu0 %v1972_v8 }
  0xc1   :  { %1824 = vmatpush3.bf16.msra.mxu1 %v1973_v9  ;;  %1803 = vmatprep.subr.bf16.mxu0 %v1974_v10 }
  0xc2   :  { %1825 = vmatprep.subr.bf16.mxu1 %v1975_v11 }
  0xc4   :  { %1804 = vmatpush3.bf16.msra.mxu0 %v1976_v12 }
  0xc5   :  { %1826 = vmatpush3.bf16.msra.mxu1 %v1977_v13  ;;  %1805 = vmatprep.subr.bf16.mxu0 %v1978_v14 }
  0xc6   :  { %1827 = vmatprep.subr.bf16.mxu1 %v1979_v15 }
  0xc8   :  { %1806 = vmatpush3.bf16.msra.mxu0 %v1980_v16 }
  0xc9   :  { %1828 = vmatpush3.bf16.msra.mxu1 %v1981_v17 }
  0xcb   :  { %1434 = vmatmul.mubr.bf16.vlgmr.msra.gmra.mrb[12].mxu0 %v1589_v20 }
  0xcc   :  { %1474 = vmatmul.mubr.bf16.vlgmr.msra.gmra.mrb[12].mxu1 %v1591_v22 }
 0x13e   :  { %v1675_v24 = vpop.f32.mrb[0].mxu0 }
 0x13f   :  { %v1697_v25 = vpop.f32.mrb[0].mxu1  ;;  %v1676_v26 = vpop.f32.mrb[1].mxu0 }
 0x140   :  { %v1698_v27 = vpop.f32.mrb[1].mxu1  ;;  %v1677_v28 = vadd.f32 %v1676_v26, %v1675_v24  ;;  %v1678_v30 = vpop.f32.mrb[2].mxu0 }
 0x141   :  { %v1699_v29 = vadd.f32 %v1698_v27, %v1697_v25  ;;  %v1700_v31 = vpop.f32.mrb[2].mxu1  ;;  %v1679_v32 = vpop.f32.mrb[3].mxu0 }
 0x142   :  { %v1701_v33 = vpop.f32.mrb[3].mxu1 }
 0x143   :  { %v824_v34 = vadd.f32 %v1699_v29, %v1677_v28 }
 0x15e   :  { %v1719_v35 = vpop.f32.mrb[4].mxu0 }
 0x15f   :  { %v1741_v36 = vpop.f32.mrb[4].mxu1  ;;  %v1720_v37 = vpop.f32.mrb[5].mxu0 }
 0x160   :  { %v1742_v38 = vpop.f32.mrb[5].mxu1  ;;  %v1721_v39 = vadd.f32 %v1720_v37, %v1719_v35  ;;  %v1722_v41 = vpop.f32.mrb[6].mxu0 }
 0x161   :  { %v1743_v40 = vadd.f32 %v1742_v38, %v1741_v36  ;;  %v1744_v42 = vpop.f32.mrb[6].mxu1  ;;  %v1723_v43 = vpop.f32.mrb[7].mxu0 }
 0x162   :  { %v1745_v44 = vpop.f32.mrb[7].mxu1  ;;  %v864_v45 = vadd.f32 %v1721_v39, %v824_v34 }
 0x164   :  { %v904_v46 = vadd.f32 %v1743_v40, %v864_v45 }
 0x17e   :  { %v1763_v47 = vpop.f32.mrb[8].mxu0 }
 0x17f   :  { %v1785_v48 = vpop.f32.mrb[8].mxu1  ;;  %v1764_v49 = vpop.f32.mrb[9].mxu0 }
 0x180   :  { %v1765_v50 = vadd.f32 %v1764_v49, %v1763_v47  ;;  %v1786_v51 = vpop.f32.mrb[9].mxu1  ;;  %v1766_v52 = vpop.f32.mrb[10].mxu0 }
 0x181   :  { %v1787_v53 = vadd.f32 %v1786_v51, %v1785_v48  ;;  %v1788_v54 = vpop.f32.mrb[10].mxu1  ;;  %v1767_v55 = vpop.f32.mrb[11].mxu0 }
 0x182   :  { %v1356_v56 = vadd.f32 %v1765_v50, %v904_v46  ;;  %v1789_v57 = vpop.f32.mrb[11].mxu1 }
 0x184   :  { %v1396_v58 = vadd.f32 %v1787_v53, %v1356_v56 }
 0x19e   :  { %v1807_v59 = vpop.f32.mrb[12].mxu0 }
 0x19f   :  { %v1829_v60 = vpop.f32.mrb[12].mxu1  ;;  %v1808_v61 = vpop.f32.mrb[13].mxu0 }
 0x1a0   :  { %v1809_v62 = vadd.f32 %v1808_v61, %v1807_v59  ;;  %v1830_v63 = vpop.f32.mrb[13].mxu1  ;;  %v1810_v0 = vpop.f32.mrb[14].mxu0 }
 0x1a1   :  { %v1831_v1 = vadd.f32 %v1830_v63, %v1829_v60  ;;  %v1832_v2 = vpop.f32.mrb[14].mxu1  ;;  %v1811_v3 = vpop.f32.mrb[15].mxu0 }
 0x1a2   :  { %v1436_v4 = vadd.f32 %v1809_v62, %v1396_v58  ;;  %v1833_v5 = vpop.f32.mrb[15].mxu1 }
 0x1a4   :  { %v1476_v7 = vadd.f32 %v1831_v1, %v1436_v4 }
 0x1a6   :  { %v1488_v8 = vadd.f32 %v1657_v6, %v1476_v7 }
 0x1a8   :  { %v1658_v9 = vmul.f32 -1.442695, %v1488_v8 }
 0x1aa   :  { %1986 = vpow2.f32 %v1658_v9 }
 0x1b4   :  { %v1987_v10 = vpop.eup %1986 }
 0x1b5   :  { %v1492_v11 = vadd.f32 1.0, %v1987_v10 }
 0x1b7   :  { %1988 = vrcp.f32 %v1492_v11 }
 0x1c1   :  { %v1989_v12 = vpop.eup %1988 }
 0x1c2   :  { %1495 = vst [vmem:[#allocation10] sm:$0xff] %v1989_v12 }
 0x1c3   :  { %2089 = shalt.err (!%p2086_p8)
}
 0x1c4   :  { %s2090_s19 = scalar_lea.hbm %s2213_s5, 128 }
 0x1c5   :  { %p2091_p9 = scmp.ne.s32.totalorder %s2213_s5, %s2090_s19  ;;  %p2094_p10 = scmp.lt.u32.totalorder %s2090_s19, %s2213_s5 }
 0x1c7   :  { %p2096_p11 = pnand %p2094_p10, %p2091_p9 }
 0x1c9   :  { %2099 = shalt.err (!%p2096_p11)
}
 0x1ca   :  { %1505 = dma.vmem_to_hbm [thread:$0]  %s1503_s16, 128, %s2213_s5, [#allocation4]  }
 0x1cb   :  { %2106 = dma.done.wait [#allocation4], 128  }
 0x1cc   :  { %2107 = vsyncadd [#allocation4], 4294967168 }
 0x1cd   :  { %1509 = vsyncpa [#allocation3], 1 }
 0x1ce   :  { %1510 = vsyncpa [#allocation6], 1 }
 0x1cf   :  { %1511 = vsyncpa [#allocation9], 1 }
 0x1d0   :  { %1512 = vsyncpa [#allocation4], 1 }

</bundles_post_ra>
